<compile_context>
chip_gen: v5e
topology: v5e:2x2
jax: 0.10.0
libtpu: 0.0.40
codegen_flags: <defaults>
</compile_context>

<pallas_src>
import functools

import jax
import jax.numpy as jnp
from jax.experimental import pallas as pl
from jax.experimental.pallas import tpu as pltpu


def _round_up(x: int, m: int) -> int:
    return ((x + m - 1) // m) * m


def _round_down(x: int, m: int) -> int:
    return (x // m) * m


def _cdiv(a: int, b: int) -> int:
    return (a + b - 1) // b


def _patch_embed_kernel(p_ref, w_ref, b_ref, o_ref):
    # p_ref: (TM, K_pad) bf16 patch rows; w_ref: (K_pad, N_pad) bf16 (resident);
    # b_ref: (1, N_pad) f32 (resident); o_ref: (TM, N_pad) out_dtype.
    acc = jnp.dot(p_ref[...], w_ref[...], preferred_element_type=jnp.float32)
    o_ref[...] = (acc + b_ref[...]).astype(o_ref.dtype)


def patch_embed(x, weight, bias, kernel_size, padding=(0, 0), *,
                tm_max=1024, compute_dtype=jnp.bfloat16, out_dtype=None):
    """
    x:      (B, C, H, W)            (NCHW, PyTorch convention)
    weight: (embed_dim, C, kh, kw)  (PyTorch Conv2d weight layout)
    bias:   (embed_dim,)
    returns (B, Hp, Wp, embed_dim)  ==  conv2d(x).permute(0, 2, 3, 1)

    Precision: operands are cast to `compute_dtype` (bf16) and the output is
    stored in `out_dtype` (defaults to compute_dtype); accumulation is f32 on
    the MXU.  Pass out_dtype=jnp.float32 for an f32 output.
    """
    kh, kw = kernel_size
    ph, pw = padding
    if ph or pw:
        x = jnp.pad(x, ((0, 0), (0, 0), (ph, ph), (pw, pw)))

    B, C, H, W = x.shape
    N = weight.shape[0]
    assert H % kh == 0 and W % kw == 0, "stride == kernel: dims must divide"
    Hp, Wp = H // kh, W // kw
    M, K = B * Hp * Wp, C * kh * kw
    out_dtype = compute_dtype if out_dtype is None else out_dtype

    # --- lane-dense K and N: pad both up to multiples of 128 (zeros are free
    # numerically; K=768 / N=768 production shapes need no padding).
    K_pad = _round_up(K, 128)
    N_pad = _round_up(N, 128)

    # --- im2col: explicit (M, K_pad) bf16 patch tensor (XLA copy fusion).
    # Flatten order (C, kh, kw) matches the Conv2d reduction sum_{c,i,j}.
    patches = x.reshape(B, C, Hp, kh, Wp, kw)
    patches = jnp.transpose(patches, (0, 2, 4, 1, 3, 5))      # (B,Hp,Wp,C,kh,kw)
    patches = patches.reshape(M, K).astype(compute_dtype)
    patches = jnp.pad(patches, ((0, 0), (0, K_pad - K)))

    w_mat = jnp.pad(weight.reshape(N, K).T.astype(compute_dtype),
                    ((0, K_pad - K), (0, N_pad - N)))          # (K_pad, N_pad)
    b_mat = jnp.pad(bias.astype(jnp.float32).reshape(1, N),
                    ((0, 0), (0, N_pad - N)))                  # (1, N_pad)

    # --- row-tile selection (no M padding: cdiv grid, ragged last block masked)
    if M >= tm_max:
        TM = tm_max
    else:
        TM = max(16, _round_down(M, 16))                       # bf16 sublane-aligned
    if M > 512:                                                # v7x megacore: >= 2 steps
        TM = min(TM, _round_up(_cdiv(M, 2), 256))

    in_isz = jnp.dtype(compute_dtype).itemsize
    out_isz = jnp.dtype(out_dtype).itemsize

    def working_set(tm):
        return (2 * tm * K_pad * in_isz        # patch tile, double-buffered
                + K_pad * N_pad * in_isz       # weight, single-buffered (resident)
                + N_pad * 4                    # bias, single-buffered (resident)
                + 2 * tm * N_pad * out_isz)    # output tile, double-buffered

    # v5e guard: keep the working set comfortably under the 16 MiB default scope.
    while TM > 128 and working_set(TM) > (12 << 20):
        TM //= 2
    TM = max(16, _round_down(TM, 16))
    grid_m = _cdiv(M, TM)

    vmem_limit = int(min(max(2 * working_set(TM), 32 << 20), 64 << 20))

    cost = pl.CostEstimate(
        flops=2 * M * K_pad * N_pad,
        transcendentals=0,
        bytes_accessed=(M * K_pad * in_isz + K_pad * N_pad * in_isz
                        + N_pad * 4 + M * N_pad * out_isz),
    )

    out = pl.pallas_call(
        _patch_embed_kernel,
        out_shape=jax.ShapeDtypeStruct((M, N_pad), out_dtype),
        grid_spec=pltpu.PrefetchScalarGridSpec(
            num_scalar_prefetch=0,
            grid=(grid_m,),
            in_specs=[
                pl.BlockSpec((TM, K_pad), lambda i: (i, 0)),           # patch tile
                pl.BlockSpec((K_pad, N_pad), lambda i: (0, 0),
                             pipeline_mode=pl.Buffered(1)),            # weight (resident)
                pl.BlockSpec((1, N_pad), lambda i: (0, 0),
                             pipeline_mode=pl.Buffered(1)),            # bias   (resident)
            ],
            out_specs=pl.BlockSpec((TM, N_pad), lambda i: (i, 0)),
        ),
        compiler_params=pltpu.CompilerParams(
            dimension_semantics=("parallel",),                         # megacore split on M
            vmem_limit_bytes=vmem_limit,
        ),
        cost_estimate=cost,
    )(patches, w_mat, b_mat)

    if N_pad != N:
        out = out[:, :N]
    return out.reshape(B, Hp, Wp, N)


if __name__ == "__main__":
    # Small shapes consistent with the module: B=2, in_chans=3, 24x24 image,
    # kernel=stride=(8,8) -> Hp=Wp=3 (M=18 exercises the ragged-block path),
    # embed_dim=32 (exercises K/N lane padding to 256/128). Output: (2,3,3,32).
    B, C, H, W = 2, 3, 24, 24
    kh, kw = 8, 8
    embed_dim = 32

    key = jax.random.PRNGKey(0)
    kx, kw_, kb = jax.random.split(key, 3)

    x = jax.random.normal(kx, (B, C, H, W), dtype=jnp.float32)
    fan_in = C * kh * kw
    bound = 1.0 / (fan_in ** 0.5)
    weight = jax.random.uniform(kw_, (embed_dim, C, kh, kw),
                                minval=-bound, maxval=bound, dtype=jnp.float32)
    bias = jax.random.uniform(kb, (embed_dim,),
                              minval=-bound, maxval=bound, dtype=jnp.float32)

    fn = jax.jit(functools.partial(patch_embed, kernel_size=(kh, kw)))
    out = jax.block_until_ready(fn(x, weight, bias))

    # reference: XLA conv (f32), permuted to (B, Hp, Wp, embed_dim)
    ref = jax.lax.conv_general_dilated(
        x, weight, window_strides=(kh, kw), padding="VALID",
        dimension_numbers=("NCHW", "OIHW", "NCHW"),
    ) + bias.reshape(1, embed_dim, 1, 1)
    ref = jnp.transpose(ref, (0, 2, 3, 1))

    assert out.shape == (B, H // kh, W // kw, embed_dim)
    # bf16 operands + bf16 output store (f32 accumulation): loosened tolerance
    # vs. the f32 reference.
    err = float(jnp.max(jnp.abs(out.astype(jnp.float32) - ref)))
    assert err < 5e-2, err

    print("KERNEL_OK")
</pallas_src>

<mosaic_0001>
module attributes {stable_mosaic.version = 11 : i64} {
  func.func @_patch_embed_kernel(%arg0: i32, %arg1: memref<16x256xbf16, #tpu.memory_space<vmem>>, %arg2: memref<256x128xbf16, #tpu.memory_space<vmem>>, %arg3: memref<1x128xf32, #tpu.memory_space<vmem>>, %arg4: memref<16x128xbf16, #tpu.memory_space<vmem>>) attributes {dimension_semantics = [#tpu.dimension_semantics<parallel>], iteration_bounds = array<i64: 2>, scalar_prefetch = 0 : i64, scratch_operands = 0 : i64, tpu.core_type = #tpu.core_type<tc>, window_params = [{transform_indices = @transform_0, window_bounds = array<i64: 16, 256>}, {pipeline_mode = #tpu.pipeline_mode<synchronous>, transform_indices = @transform_1, window_bounds = array<i64: 256, 128>}, {pipeline_mode = #tpu.pipeline_mode<synchronous>, transform_indices = @transform_2, window_bounds = array<i64: 1, 128>}, {transform_indices = @transform_3, window_bounds = array<i64: 16, 128>}]} {
    %c0 = arith.constant 0 : index
    %c0_0 = arith.constant 0 : index
    %0 = vector.load %arg1[%c0, %c0_0] : memref<16x256xbf16, #tpu.memory_space<vmem>>, vector<16x256xbf16>
    %c0_1 = arith.constant 0 : index
    %c0_2 = arith.constant 0 : index
    %1 = vector.load %arg2[%c0_1, %c0_2] : memref<256x128xbf16, #tpu.memory_space<vmem>>, vector<256x128xbf16>
    %cst = arith.constant dense<0.000000e+00> : vector<16x128xf32>
    %2 = tpu.matmul %0, %1, %cst {dimension_numbers = #tpu.dot_dimension_numbers<[1], [0], [0], [1], [0, 0, 1, 1], [], []>} : vector<16x256xbf16>, vector<256x128xbf16>, vector<16x128xf32> -> vector<16x128xf32>
    %c0_3 = arith.constant 0 : index
    %c0_4 = arith.constant 0 : index
    %3 = vector.load %arg3[%c0_3, %c0_4] : memref<1x128xf32, #tpu.memory_space<vmem>>, vector<1x128xf32>
    %4 = vector.broadcast %3 : vector<1x128xf32> to vector<16x128xf32>
    %5 = arith.addf %2, %4 : vector<16x128xf32>
    %6 = arith.truncf %5 : vector<16x128xf32> to vector<16x128xbf16>
    %c0_5 = arith.constant 0 : index
    %c0_6 = arith.constant 0 : index
    %7 = vector.load %arg4[%c0_5, %c0_6] : memref<16x128xbf16, #tpu.memory_space<vmem>>, vector<16x128xbf16>
    tpu.vector_store %arg4[%c0_5, %c0_6], %6 {strides = array<i32>} : memref<16x128xbf16, #tpu.memory_space<vmem>>, vector<16x128xbf16>,
    return
  }
  func.func @transform_0(%arg0: i32) -> (i32, i32) {
    %c0_i32 = arith.constant 0 : i32
    %c0_i32_0 = arith.constant 0 : i32
    return %arg0, %c0_i32 : i32, i32
  }
  func.func @transform_1(%arg0: i32) -> (i32, i32) {
    %c0_i32 = arith.constant 0 : i32
    %c0_i32_0 = arith.constant 0 : i32
    %c0_i32_1 = arith.constant 0 : i32
    return %c0_i32, %c0_i32_0 : i32, i32
  }
  func.func @transform_2(%arg0: i32) -> (i32, i32) {
    %c0_i32 = arith.constant 0 : i32
    %c0_i32_0 = arith.constant 0 : i32
    %c0_i32_1 = arith.constant 0 : i32
    return %c0_i32, %c0_i32_0 : i32, i32
  }
  func.func @transform_3(%arg0: i32) -> (i32, i32) {
    %c0_i32 = arith.constant 0 : i32
    %c0_i32_0 = arith.constant 0 : i32
    return %arg0, %c0_i32 : i32, i32
  }
}

</mosaic_0001>

<bundles_post_ra>
// kernel: patch_embed.1
= control target key start
LH: loop header
LB: loop body
LE: loop exit
PB: predicated region body
PF: predicated region fallthrough
CT: control target
= control target key end

     0   :  { %s917_s12 = smov 0   ;;  %s919_s13 = smov 0   ;;  %s1050_s0 = inlined_call_operand.vmem [shape: bf16[18,256], index: 0, kind: input, shape index: {}]   ;;  %s1051_s1 = inlined_call_operand.vmem [shape: bf16[256,128], index: 1, kind: input, shape index: {}]   ;;  %s1052_s2 = inlined_call_operand.vmem [shape: f32[1,128], index: 2, kind: input, shape index: {}]   ;;  %s1053_s3 = inlined_call_operand.vmem [shape: bf16[18,128], index: 3, kind: output, shape index: {}]  }
   0x1   :  { %s921_s14 = smov 0  }
   0x2 LB: > { %s930_s15 = sadd.s32 4294967295, %s863_s14   ;;  %s932_s16 = sadd.s32 1, %s863_s14   ;;  %s863_s14 = sphi %s921_s14, %s1057_s14   ;;  %s859_s13 = sphi %s919_s13, %s1056_s13   ;;  %s855_s12 = sphi %s917_s12, %s1055_s12  }
   0x3   : > { %s85_s17 = ssub.s32 %s863_s14, %s932_s16  ;;  %s88_s18 = sadd.s32 1, %s859_s13 }
   0x4   : > { %p86_p0 = scmp.eq.s32.totalorder %s85_s17, 0  ;;  %p98_p1 = scmp.ne.s32.totalorder %s859_s13, %s855_s12 }
   0x5   : > { %p99_p2 = scmp.eq.s32.totalorder %s930_s15, 1  ;;  %p599_p3 = scmp.ge.s32.totalorder %s863_s14, 1 }
   0x6   : > { %s940_s19 = scalar_select %p86_p0, %s859_s13, %s88_s18  }
   0x7   : > { %p942_p4 = por %p99_p2, %p98_p1  ;;  %p149_p5 = scmp.lt.s32.totalorder %s863_s14, 3 }
   0x9   : > { %p150_p6 = pnand %p599_p3, %p149_p5 }
   0xa   : > { %s965_s6 = sshll.u32 (!%p150_p6), %s930_s15, 1  ;;  %s175_s18 = sand.u32 (!%p150_p6), 1, %s855_s12  }
   0xb   : > { %153 = sbr.rel (%p150_p6) target bundleno = 228 (0xe4), region = 32  ;;  %p184_p7 = scmp.lt.s32.totalorder (!%p150_p6), %s965_s6, 2 }
  0x10   : > { %v703_v0 = vld [vmem:[%s1051_s1 + $0x38] sm:$0xff]  ;;  %v702_v2 = vld [vmem:[%s1051_s1 + $0x30] sm:$0xff]  ;;  %v701_v4 = vld [vmem:[%s1051_s1 + $0x28] sm:$0xff]  ;;  %s185_s21 = scalar_select %p184_p7, %s965_s6, 2 }
  0x11   : > { %v711_v1 = vld [vmem:[%s1051_s1 + $0x78] sm:$0xff]  ;;  %344 = vmatpush.bf16.msra.mxu0 %v703_v0  ;;  %v710_v3 = vld [vmem:[%s1051_s1 + $0x70] sm:$0xff]  ;;  %v709_v5 = vld [vmem:[%s1051_s1 + $0x68] sm:$0xff]  ;;  %s384_s23 = ssub.s32 (%p942_p4), 3, %s965_s6  ;;  %s712_s24 = sshll.u32 (%p942_p4), %s930_s15, 3 }
  0x12   : > { %358 = vmatpush.bf16.msra.mxu1 %v711_v1  ;;  %v700_v6 = vld [vmem:[%s1051_s1 + $0x20] sm:$0xff]  ;;  %v699_v8 = vld [vmem:[%s1051_s1 + $0x18] sm:$0xff]  ;;  %v698_v10 = vld [vmem:[%s1051_s1 + $0x10] sm:$0xff]  ;;  %s693_s26 = sshll.u32 %s185_s21, 3  ;;  %s600_s21 = sshll.u32 %s175_s18, 3 }
  0x13   : > { %v708_v7 = vld [vmem:[%s1051_s1 + $0x60] sm:$0xff]  ;;  %v707_v9 = vld [vmem:[%s1051_s1 + $0x58] sm:$0xff]  ;;  %v706_v11 = vld [vmem:[%s1051_s1 + $0x50] sm:$0xff]  ;;  %s188_s7 = scalar_lea.vmem %s1050_s0, %s693_s26  ;;  %s1006_s22 = scalar_lea.vmem [#allocation2], %s600_s21  }
  0x14   : > { %v697_v12 = vld [vmem:[%s1051_s1 + $0x8] sm:$0xff]  ;;  %v696_v14 = vld [vmem:[%s1051_s1] sm:$0xff]  ;;  %p385_p8 = scmp.lt.s32.totalorder (%p942_p4), %s384_s23, 2  ;;  %s1016_s26 = scalar_lea.vmem (%p942_p4), %s1053_s3, %s712_s24  }
  0x15   : > { %345 = vmatpush.bf16.msra.mxu0 %v702_v2  ;;  %v705_v13 = vld [vmem:[%s1051_s1 + $0x48] sm:$0xff]  ;;  %v704_v15 = vld [vmem:[%s1051_s1 + $0x40] sm:$0xff] }
  0x16   : > { %359 = vmatpush.bf16.msra.mxu1 %v710_v3  ;;  %v606_v16 = vld [vmem:[%s188_s7] sm:$0xf]  ;;  %v695_v17 = vld [vmem:[%s188_s7 + $0x4] sm:$0xf0]  ;;  %v694_v18 = vld [vmem:[%s188_s7 + $0x4] sm:$0xf] }
  0x17   : > { %v608_v19 = vld [vmem:[%s188_s7 + $0x8] sm:$0xf0]  ;;  %v607_v20 = vor.u32 %v695_v17, %v606_v16  ;;  %v808_v24 = vld [vmem:[%s1052_s2] ss:$0 sm:$0xff] }
  0x18   : > { %v611_v21 = vor.u32 %v694_v18, %v608_v19 }
  0x19   : > { %346 = vmatpush.bf16.msra.mxu0 %v701_v4 }
  0x1a   : > { %360 = vmatpush.bf16.msra.mxu1 %v709_v5 }
  0x1d   : > { %347 = vmatpush.bf16.msra.mxu0 %v700_v6 }
  0x1e   : > { %361 = vmatpush.bf16.msra.mxu1 %v708_v7 }
  0x21   : > { %348 = vmatpush.bf16.msra.mxu0 %v699_v8 }
  0x22   : > { %362 = vmatpush.bf16.msra.mxu1 %v707_v9 }
  0x25   : > { %349 = vmatpush.bf16.msra.mxu0 %v698_v10 }
  0x26   : > { %363 = vmatpush.bf16.msra.mxu1 %v706_v11 }
  0x29   : > { %350 = vmatpush.bf16.msra.mxu0 %v697_v12 }
  0x2a   : > { %364 = vmatpush.bf16.msra.mxu1 %v705_v13 }
  0x2d   : > { %351 = vmatpush.bf16.msra.mxu0 %v696_v14 }
  0x2e   : > { %365 = vmatpush.bf16.msra.mxu1 %v704_v15 }
  0x30   : > { %352 = vmatmul.bf16.vlgmr.msra.gmra.mxu0 %v607_v20 }
  0x31   : > { %366 = vmatmul.bf16.vlgmr.msra.gmra.mxu1 %v611_v21 }
  0xad   : > { %v353_v22 = vpop.f32.mrf.mxu0 }
  0xae   : > { %v367_v23 = vpop.f32.mrf.mxu1  ;;  %v354_v25 = vadd.f32 %v808_v24, %v353_v22 }
  0xb0   : > { %v368_v29 = vadd.f32 %v367_v23, %v354_v25 }
  0xb5   : > { %v355_v26 = vpop.f32.mrf.mxu0 }
  0xb6   : > { %v356_v27 = vadd.f32 %v808_v24, %v355_v26  ;;  %v369_v28 = vpop.f32.mrf.mxu1 }
  0xb8   : > { %v370_v30 = vadd.f32 %v369_v28, %v356_v27  ;;  %382 = sbr.rel (!%p942_p4) target bundleno = 228 (0xe4), region = 36 }
  0xba   : > { %v718_v31 = vpack.c.bf16 %v370_v30, %v368_v29 }
  0xbc   : > { %719 = vst [vmem:[%s1006_s22] sm:$0xff] %v718_v31  }
  0xbd   : > { %s1059_s23 = smov (!%p385_p8, %s384_s23), 2 }
  0xbe   : > { %s678_s27 = sshll.u32 %s1059_s23, 2 }
  0xbf   : > { %p681_p9 = scmp.eq.s32.totalorder %s678_s27, 0 }
  0xc0   : > { %s1022_s28 = sshrl.u32 (!%p681_p9), %s1059_s23, 1 }
  0xc1   : > { %393 = sbr.rel (%p681_p9) target bundleno = 228 (0xe4), region = 40  ;;  %p682_p10 = scmp.le.s32.totalorder (!%p681_p9), %s1022_s28, 0 }
  0xc6   : > { %552 = sbr.rel (%p682_p10) target bundleno = 211 (0xd3), region = 112  ;;  %s865_s15 = smov (!%p682_p10), %s1016_s26  }
  0xc7   : > { %s869_s20 = smov (!%p682_p10), %s1006_s22   ;;  %s873_s6 = smov (!%p682_p10), 0  }
  0xc8   : > { %s877_s29 = smov (!%p682_p10), 0  }
  0xcb LB: >> { %v410_v32 = vld [vmem:[%s871_s20] sm:$0xf]  ;;  %v412_v33 = vld [vmem:[%s871_s20 + $0x4] sm:$0xf]  ;;  %s414_s30 = sadd.s32 1, %s875_s6  ;;  %s404_s29 = sadd.s32 1, %s879_s29   ;;  %s879_s29 = sphi %s877_s29, %s404_s29   ;;  %s875_s6 = sphi %s873_s6, %s874_s6   ;;  %s871_s20 = sphi %s869_s20, %s419_s20   ;;  %s867_s15 = sphi %s865_s15, %s420_s15  }
  0xcc   : >> { %411 = vst [vmem:[%s867_s15] sm:$0xf] %v410_v32  ;;  %p415_p11 = scmp.ge.s32.totalorder %s414_s30, %s1022_s28  ;;  %p403_p12 = scmp.ge.s32.totalorder %s404_s29, %s1022_s28 }
  0xcd   : >> { %413 = vst [vmem:[%s867_s15 + $0x4] sm:$0xf] %v412_v33 }
  0xce   : >> { %s1061_s30 = smov (%p415_p11, %s414_s30), 0  ;;  %406 = sbr.rel (!%p403_p12) target bundleno = 203 (0xcb), region = 118 }
  0xcf   : >> { %s683_s4 = sshll.u32 %s1061_s30, 3  ;;  %s874_s6 = smov %s1061_s30  }
  0xd0   : >> { %s419_s20 = scalar_lea.vmem %s1006_s22, %s683_s4 [#allocation2]   ;;  %s420_s15 = scalar_lea.vmem %s1016_s26, %s683_s4  }
  0xd3 PF: > { %s1032_s5 = sand.u32 1, %s1059_s23   ;;  %s713_s7 = sshll.u32 %s1022_s28, 3 }
  0xd4   : > { %s425_s8 = scalar_lea.vmem %s1006_s22, %s713_s7 [#allocation2]   ;;  %s427_s9 = scalar_lea.vmem %s1016_s26, %s713_s7  }
  0xd5   : > { %p688_p13 = scmp.le.s32.totalorder %s1032_s5, 0 }
  0xd6   : > { %s881_s10 = smov (!%p688_p13), %s427_s9   ;;  %s885_s11 = smov (!%p688_p13), %s425_s8  }
  0xd7   : > { %566 = sbr.rel (%p688_p13) target bundleno = 228 (0xe4), region = 123  ;;  %s889_s14 = smov (!%p688_p13), 0  }
  0xd8   : > { %s893_s17 = smov (!%p688_p13), 0  }
  0xdc LB: >> { %v437_v34 = vld [vmem:[%s887_s11] sm:$0xf]  ;;  %s439_s18 = sadd.s32 1, %s891_s14  ;;  %s431_s17 = sadd.s32 1, %s895_s17   ;;  %s895_s17 = sphi %s893_s17, %s431_s17   ;;  %s891_s14 = sphi %s889_s14, %s890_s14   ;;  %s887_s11 = sphi %s885_s11, %s444_s11   ;;  %s883_s10 = sphi %s881_s10, %s445_s10  }
  0xdd   : >> { %438 = vst [vmem:[%s883_s10] sm:$0xf] %v437_v34  ;;  %p440_p0 = scmp.ge.s32.totalorder %s439_s18, %s1032_s5  ;;  %p430_p1 = scmp.ge.s32.totalorder %s431_s17, %s1032_s5 }
  0xdf   : >> { %s1063_s18 = smov (%p440_p0, %s439_s18), 0  ;;  %433 = sbr.rel (!%p430_p1) target bundleno = 220 (0xdc), region = 129 }
  0xe0   : >> { %s689_s21 = sshll.u32 %s1063_s18, 2  ;;  %s890_s14 = smov %s1063_s18  }
  0xe1   : >> { %s444_s11 = scalar_lea.vmem %s425_s8, %s689_s21 [#allocation2]   ;;  %s445_s10 = scalar_lea.vmem %s427_s9, %s689_s21  }
  0xe4 PF: > { %p10_p2 = scmp.ge.s32.totalorder %s932_s16, 4   ;;  %s1055_s12 = smov %s859_s13 }
  0xe5   : > { %s1056_s13 = smov %s940_s19  ;;  %s1057_s14 = smov %s932_s16 }
  0xe6   :  { %12 = sbr.rel (!%p10_p2) target bundleno = 2 (0x2), region = 140 }

</bundles_post_ra>
